<compile_context>
chip_gen: v7x
topology: tpu7x:2x2x1
jax: 0.10.0
libtpu: 0.0.40
codegen_flags: <defaults>
</compile_context>

<pallas_src>
import functools

import jax
import jax.numpy as jnp
from jax.experimental import pallas as pl
from jax.experimental.pallas import tpu as pltpu


def _round_up(x, m):
    return (x + m - 1) // m * m


# ----------------------------------------------------------------------------
# Fused GRU layer kernel: chunk input-projection GEMM + serial recurrence.
# ----------------------------------------------------------------------------
def _gru_layer_kernel(x_ref, wih_ref, whh_ref, bfold_ref, bhn_ref,
                      y_ref, hT_ref, ig_scr, h_scr, *, t_valid, mask_time):
    c = pl.program_id(1)                  # time-chunk index (sequential, "arbitrary")
    nc = pl.num_programs(1)
    TC, Bs, Din = x_ref.shape
    Hp = whh_ref.shape[0]

    @pl.when(c == 0)
    def _():
        h_scr[...] = jnp.zeros_like(h_scr)

    # ---- Chunk-level input projection (one big MXU GEMM, result stays in VMEM) ----
    x2d = x_ref[...].astype(jnp.float32).reshape(TC * Bs, Din)      # free reshape (Bs % 8 == 0)
    ig = jnp.dot(x2d, wih_ref[...], preferred_element_type=jnp.float32) + bfold_ref[...]
    ig_scr[...] = ig.reshape(TC, Bs, 3 * Hp)

    # Resident weights / hoisted broadcasts (once per chunk, not per step).
    whh = whh_ref[...]                                              # (Hp, 3Hp)
    b_hn = jnp.broadcast_to(bhn_ref[...], (Bs, Hp)).astype(jnp.float32)
    t_base = c * TC

    def step(i, h):
        g = ig_scr[i]                                               # (Bs, 3Hp) pre-projected
        hg = jnp.dot(h, whh, preferred_element_type=jnp.float32)    # single fused per-step dot
        r = jax.nn.sigmoid(g[:, 0:Hp] + hg[:, 0:Hp])
        z = jax.nn.sigmoid(g[:, Hp:2 * Hp] + hg[:, Hp:2 * Hp])
        n = jnp.tanh(g[:, 2 * Hp:3 * Hp] + r * (hg[:, 2 * Hp:3 * Hp] + b_hn))
        h_new = n + z * (h - n)
        if mask_time:  # static: only when the time axis is actually padded
            h_new = jnp.where(t_base + i < t_valid, h_new, h)
        y_ref[i] = h_new.astype(y_ref.dtype)
        return h_new

    h_last = jax.lax.fori_loop(0, TC, step, h_scr[...])
    h_scr[...] = h_last

    @pl.when(c == nc - 1)
    def _():
        hT_ref[...] = h_last.astype(hT_ref.dtype)


def gru_layer(x_tm, w_ih_p, w_hh_p, b_fold, b_hn, *, t_valid, time_chunk, batch_shards):
    """x_tm: (Tp, Bp, Din) time-major padded input.  Returns (y (Tp,Bp,Hp), hT (Bp,Hp))."""
    Tp, Bp, Din = x_tm.shape
    Hp = w_hh_p.shape[0]
    Bs = Bp // batch_shards
    nc = Tp // time_chunk
    mask_time = (Tp != t_valid)

    kernel = functools.partial(_gru_layer_kernel, t_valid=t_valid, mask_time=mask_time)
    y, hT = pl.pallas_call(
        kernel,
        out_shape=(
            jax.ShapeDtypeStruct((Tp, Bp, Hp), jnp.float32),
            jax.ShapeDtypeStruct((Bp, Hp), jnp.float32),
        ),
        grid_spec=pltpu.PrefetchScalarGridSpec(
            num_scalar_prefetch=0,
            grid=(batch_shards, nc),
            in_specs=[
                pl.BlockSpec((time_chunk, Bs, Din), lambda b, c: (c, b, 0)),  # x chunk
                pl.BlockSpec((Din, 3 * Hp), lambda b, c: (0, 0)),             # W_ih (resident)
                pl.BlockSpec((Hp, 3 * Hp), lambda b, c: (0, 0)),              # W_hh (resident)
                pl.BlockSpec((1, 3 * Hp), lambda b, c: (0, 0)),               # folded bias
                pl.BlockSpec((1, Hp), lambda b, c: (0, 0)),                   # b_hh_n
            ],
            out_specs=[
                pl.BlockSpec((time_chunk, Bs, Hp), lambda b, c: (c, b, 0)),   # y chunk
                pl.BlockSpec((Bs, Hp), lambda b, c: (b, 0)),                  # final hidden
            ],
            scratch_shapes=[
                pltpu.VMEM((time_chunk, Bs, 3 * Hp), jnp.float32),            # chunk i-gates
                pltpu.VMEM((Bs, Hp), jnp.float32),                            # carried h state
            ],
        ),
        compiler_params=pltpu.CompilerParams(
            dimension_semantics=("parallel", "arbitrary"),
            vmem_limit_bytes=64 * 1024 * 1024,
        ),
    )(x_tm, w_ih_p, w_hh_p, b_fold, b_hn)
    return y, hT


# ----------------------------------------------------------------------------
# Encoder (JAX/Pallas equivalent of nn.GRU(batch_first=True) with num_layers)
# ----------------------------------------------------------------------------
class Encoder:
    def __init__(self, input_size, hidden_size, num_layers, key, time_chunk=128):
        self.input_size = input_size
        self.hidden_size = hidden_size
        self.num_layers = num_layers
        self.time_chunk = time_chunk
        self.Hp = _round_up(hidden_size, 128)

        bound = 1.0 / float(hidden_size) ** 0.5
        self.params = []  # PyTorch-equivalent params: (W_ih (Din,3H), W_hh (H,3H), b_ih, b_hh)
        for layer in range(num_layers):
            din = input_size if layer == 0 else hidden_size
            key, k1, k2, k3, k4 = jax.random.split(key, 5)
            w_ih = jax.random.uniform(k1, (din, 3 * hidden_size), jnp.float32, -bound, bound)
            w_hh = jax.random.uniform(k2, (hidden_size, 3 * hidden_size), jnp.float32, -bound, bound)
            b_ih = jax.random.uniform(k3, (3 * hidden_size,), jnp.float32, -bound, bound)
            b_hh = jax.random.uniform(k4, (3 * hidden_size,), jnp.float32, -bound, bound)
            self.params.append((w_ih, w_hh, b_ih, b_hh))

        self._prepared = [self._prepare(i, p) for i, p in enumerate(self.params)]

    def _prepare(self, layer, p):
        """Pad to (lane=128, sublane=8)-friendly shapes, fuse gates, pre-fold biases."""
        w_ih, w_hh, b_ih, b_hh = p
        H, Hp = self.hidden_size, self.Hp
        din = w_ih.shape[0]
        din_p = din if layer == 0 else Hp   # later layers consume the padded (zero-column) output

        def pad_gates(w, rows):
            out = jnp.zeros((rows, 3 * Hp), jnp.float32)
            for g in range(3):
                out = out.at[: w.shape[0], g * Hp:g * Hp + H].set(w[:, g * H:(g + 1) * H])
            return out

        w_ih_p = pad_gates(w_ih, din_p)
        w_hh_p = pad_gates(w_hh, Hp)

        b_fold = jnp.zeros((1, 3 * Hp), jnp.float32)
        b_fold = b_fold.at[0, 0 * Hp:0 * Hp + H].set(b_ih[0:H] + b_hh[0:H])          # r
        b_fold = b_fold.at[0, 1 * Hp:1 * Hp + H].set(b_ih[H:2 * H] + b_hh[H:2 * H])  # z
        b_fold = b_fold.at[0, 2 * Hp:2 * Hp + H].set(b_ih[2 * H:3 * H])              # n (b_ih only)
        b_hn = jnp.zeros((1, Hp), jnp.float32).at[0, :H].set(b_hh[2 * H:3 * H])
        return (w_ih_p, w_hh_p, b_fold, b_hn)

    def __call__(self, x):
        B, T, _ = x.shape
        H, Hp = self.hidden_size, self.Hp

        TC = min(self.time_chunk, T)
        Tp = _round_up(T, TC)
        Bp0 = _round_up(B, 8)
        BS = 2 if Bp0 >= 16 else 1            # batch-shard grid axis (2 TCs on v7x)
        Bp = _round_up(B, 8 * BS)

        # Time-major layout for the whole layer stack (only two transposes per call).
        cur = jnp.transpose(x, (1, 0, 2)).astype(jnp.float32)        # (T, B, Din)
        cur = jnp.pad(cur, ((0, Tp - T), (0, Bp - B), (0, 0)))

        finals = []
        for (w_ih_p, w_hh_p, b_fold, b_hn) in self._prepared:
            cur, hT = gru_layer(cur, w_ih_p, w_hh_p, b_fold, b_hn,
                                t_valid=T, time_chunk=TC, batch_shards=BS)
            finals.append(hT[:B, :H])

        y = jnp.transpose(cur[:T, :B, :H], (1, 0, 2)).astype(x.dtype)  # (B, T, H)
        h = jnp.stack(finals, axis=0).astype(x.dtype)                  # (num_layers, B, H)
        return y, h


# ----------------------------------------------------------------------------
# Pure-JAX reference (lax.scan) for correctness checking.
# ----------------------------------------------------------------------------
def _gru_reference(x, params):
    finals = []
    prec = jax.lax.Precision.HIGHEST
    x = x.astype(jnp.float32)
    for (w_ih, w_hh, b_ih, b_hh) in params:
        B, T, _ = x.shape
        H = w_hh.shape[0]

        def step(h, x_t, w_ih=w_ih, w_hh=w_hh, b_ih=b_ih, b_hh=b_hh):
            gi = jnp.dot(x_t, w_ih, precision=prec) + b_ih
            gh = jnp.dot(h, w_hh, precision=prec) + b_hh
            i_r, i_z, i_n = jnp.split(gi, 3, axis=-1)
            h_r, h_z, h_n = jnp.split(gh, 3, axis=-1)
            r = jax.nn.sigmoid(i_r + h_r)
            z = jax.nn.sigmoid(i_z + h_z)
            n = jnp.tanh(i_n + r * h_n)
            h_new = (1.0 - z) * n + z * h
            return h_new, h_new

        h0 = jnp.zeros((B, H), jnp.float32)
        hT, ys = jax.lax.scan(step, h0, jnp.swapaxes(x, 0, 1))
        x = jnp.swapaxes(ys, 0, 1)
        finals.append(hT)
    return x, jnp.stack(finals, axis=0)


if __name__ == "__main__":
    input_size, hidden_size, num_layers = 4, 32, 2
    batch, seq = 2, 8

    key = jax.random.PRNGKey(0)
    k_param, k_input = jax.random.split(key)

    enc = Encoder(input_size, hidden_size, num_layers, k_param)
    x = jax.random.normal(k_input, (batch, seq, input_size), dtype=jnp.float32)

    y, h = enc(x)
    y = jax.block_until_ready(y)
    h = jax.block_until_ready(h)

    y_ref, h_ref = _gru_reference(x, enc.params)
    assert y.shape == (batch, seq, hidden_size)
    assert h.shape == (num_layers, batch, hidden_size)
    assert jnp.allclose(y, y_ref, atol=1e-4, rtol=1e-4)
    assert jnp.allclose(h, h_ref, atol=1e-4, rtol=1e-4)

    # Second check: exercises time chunking + padded-step masking + 2-way batch sharding.
    enc2 = Encoder(input_size, hidden_size, num_layers, k_param, time_chunk=5)
    x2 = jax.random.normal(jax.random.PRNGKey(1), (16, 12, input_size), dtype=jnp.float32)
    y2, h2 = enc2(x2)
    y2 = jax.block_until_ready(y2)
    h2 = jax.block_until_ready(h2)
    y2_ref, h2_ref = _gru_reference(x2, enc2.params)
    assert jnp.allclose(y2, y2_ref, atol=1e-4, rtol=1e-4)
    assert jnp.allclose(h2, h2_ref, atol=1e-4, rtol=1e-4)

    print("KERNEL_OK")
</pallas_src>

<mosaic_0001>
module attributes {stable_mosaic.version = 11 : i64} {
  func.func @_gru_layer_kernel(%arg0: i32, %arg1: i32, %arg2: memref<8x8x4xf32, #tpu.memory_space<vmem>>, %arg3: memref<4x384xf32, #tpu.memory_space<vmem>>, %arg4: memref<128x384xf32, #tpu.memory_space<vmem>>, %arg5: memref<1x384xf32, #tpu.memory_space<vmem>>, %arg6: memref<1x128xf32, #tpu.memory_space<vmem>>, %arg7: memref<8x8x128xf32, #tpu.memory_space<vmem>>, %arg8: memref<8x128xf32, #tpu.memory_space<vmem>>, %arg9: memref<8x8x384xf32, #tpu.memory_space<vmem>>, %arg10: memref<8x128xf32, #tpu.memory_space<vmem>>) attributes {dimension_semantics = [#tpu.dimension_semantics<parallel>, #tpu.dimension_semantics<arbitrary>], iteration_bounds = array<i64: 1, 1>, scalar_prefetch = 0 : i64, scratch_operands = 2 : i64, tpu.core_type = #tpu.core_type<tc>, window_params = [{transform_indices = @transform_0, window_bounds = array<i64: 8, 8, 4>}, {pipeline_mode = #tpu.pipeline_mode<synchronous>, transform_indices = @transform_1, window_bounds = array<i64: 4, 384>}, {pipeline_mode = #tpu.pipeline_mode<synchronous>, transform_indices = @transform_2, window_bounds = array<i64: 128, 384>}, {pipeline_mode = #tpu.pipeline_mode<synchronous>, transform_indices = @transform_3, window_bounds = array<i64: 1, 384>}, {pipeline_mode = #tpu.pipeline_mode<synchronous>, transform_indices = @transform_4, window_bounds = array<i64: 1, 128>}, {transform_indices = @transform_5, window_bounds = array<i64: 8, 8, 128>}, {transform_indices = @transform_6, window_bounds = array<i64: 8, 128>}]} {
    %c0_i32 = arith.constant 0 : i32
    %0 = arith.cmpi eq, %arg1, %c0_i32 : i32
    %1 = arith.extui %0 : i1 to i32
    %c0_i32_0 = arith.constant 0 : i32
    %2 = arith.cmpi ne, %1, %c0_i32_0 : i32
    scf.if %2 {
      %cst_22 = arith.constant 0.000000e+00 : f32
      %23 = vector.broadcast %cst_22 : f32 to vector<8x128xf32>
      %c0_23 = arith.constant 0 : index
      %c0_24 = arith.constant 0 : index
      %24 = vector.load %arg10[%c0_23, %c0_24] : memref<8x128xf32, #tpu.memory_space<vmem>>, vector<8x128xf32>
      tpu.vector_store %arg10[%c0_23, %c0_24], %23 {strides = array<i32>} : memref<8x128xf32, #tpu.memory_space<vmem>>, vector<8x128xf32>,
    } else {
    }
    %c0 = arith.constant 0 : index
    %c0_1 = arith.constant 0 : index
    %c0_2 = arith.constant 0 : index
    %3 = vector.load %arg2[%c0, %c0_1, %c0_2] : memref<8x8x4xf32, #tpu.memory_space<vmem>>, vector<8x8x4xf32>
    %4 = vector.shape_cast %3 : vector<8x8x4xf32> to vector<64x4xf32>
    %c0_3 = arith.constant 0 : index
    %c0_4 = arith.constant 0 : index
    %5 = vector.load %arg3[%c0_3, %c0_4] : memref<4x384xf32, #tpu.memory_space<vmem>>, vector<4x384xf32>
    %cst = arith.constant dense<0.000000e+00> : vector<64x384xf32>
    %6 = tpu.matmul %4, %5, %cst {dimension_numbers = #tpu.dot_dimension_numbers<[1], [0], [0], [1], [0, 0, 1, 1], [], []>} : vector<64x4xf32>, vector<4x384xf32>, vector<64x384xf32> -> vector<64x384xf32>
    %c0_5 = arith.constant 0 : index
    %c0_6 = arith.constant 0 : index
    %7 = vector.load %arg5[%c0_5, %c0_6] : memref<1x384xf32, #tpu.memory_space<vmem>>, vector<1x384xf32>
    %8 = vector.broadcast %7 : vector<1x384xf32> to vector<64x384xf32>
    %9 = arith.addf %6, %8 : vector<64x384xf32>
    %10 = vector.shape_cast %9 : vector<64x384xf32> to vector<8x8x384xf32>
    %c0_7 = arith.constant 0 : index
    %c0_8 = arith.constant 0 : index
    %c0_9 = arith.constant 0 : index
    %11 = vector.load %arg9[%c0_7, %c0_8, %c0_9] : memref<8x8x384xf32, #tpu.memory_space<vmem>>, vector<8x8x384xf32>
    tpu.vector_store %arg9[%c0_7, %c0_8, %c0_9], %10 {strides = array<i32>} : memref<8x8x384xf32, #tpu.memory_space<vmem>>, vector<8x8x384xf32>,
    %c0_10 = arith.constant 0 : index
    %c0_11 = arith.constant 0 : index
    %12 = vector.load %arg4[%c0_10, %c0_11] : memref<128x384xf32, #tpu.memory_space<vmem>>, vector<128x384xf32>
    %c0_12 = arith.constant 0 : index
    %c0_13 = arith.constant 0 : index
    %13 = vector.load %arg6[%c0_12, %c0_13] : memref<1x128xf32, #tpu.memory_space<vmem>>, vector<1x128xf32>
    %14 = vector.shape_cast %13 : vector<1x128xf32> to vector<1x128xf32>
    %15 = vector.broadcast %14 : vector<1x128xf32> to vector<8x128xf32>
    %c0_14 = arith.constant 0 : index
    %c0_15 = arith.constant 0 : index
    %16 = vector.load %arg10[%c0_14, %c0_15] : memref<8x128xf32, #tpu.memory_space<vmem>>, vector<8x128xf32>
    %c0_i32_16 = arith.constant 0 : i32
    %c8_i32 = arith.constant 8 : i32
    %17 = arith.addi %c0_i32_16, %c8_i32 : i32
    %c1_i32 = arith.constant 1 : i32
    %18 = scf.for %arg11 = %c0_i32_16 to %17 step %c1_i32 iter_args(%arg12 = %16) -> (vector<8x128xf32>)  : i32 {
      %23 = arith.index_cast %arg11 : i32 to index
      %c0_22 = arith.constant 0 : index
      %c0_23 = arith.constant 0 : index
      %24 = vector.load %arg9[%23, %c0_22, %c0_23] : memref<8x8x384xf32, #tpu.memory_space<vmem>>, vector<1x8x384xf32>
      %25 = vector.shape_cast %24 : vector<1x8x384xf32> to vector<8x384xf32>
      %cst_24 = arith.constant dense<0.000000e+00> : vector<8x384xf32>
      %26 = tpu.matmul %arg12, %12, %cst_24 {dimension_numbers = #tpu.dot_dimension_numbers<[1], [0], [0], [1], [0, 0, 1, 1], [], []>} : vector<8x128xf32>, vector<128x384xf32>, vector<8x384xf32> -> vector<8x384xf32>
      %27 = vector.extract_strided_slice %25 {offsets = [0, 0], sizes = [8, 128], strides = [1, 1]} : vector<8x384xf32> to vector<8x128xf32>
      %28 = vector.extract_strided_slice %26 {offsets = [0, 0], sizes = [8, 128], strides = [1, 1]} : vector<8x384xf32> to vector<8x128xf32>
      %29 = arith.addf %27, %28 : vector<8x128xf32>
      %30 = arith.negf %29 : vector<8x128xf32>
      %31 = math.exp %30 : vector<8x128xf32>
      %cst_25 = arith.constant 1.000000e+00 : f32
      %32 = vector.broadcast %cst_25 : f32 to vector<8x128xf32>
      %33 = arith.addf %32, %31 : vector<8x128xf32>
      %34 = arith.divf %32, %33 : vector<8x128xf32>
      %35 = vector.extract_strided_slice %25 {offsets = [0, 128], sizes = [8, 128], strides = [1, 1]} : vector<8x384xf32> to vector<8x128xf32>
      %36 = vector.extract_strided_slice %26 {offsets = [0, 128], sizes = [8, 128], strides = [1, 1]} : vector<8x384xf32> to vector<8x128xf32>
      %37 = arith.addf %35, %36 : vector<8x128xf32>
      %38 = arith.negf %37 : vector<8x128xf32>
      %39 = math.exp %38 : vector<8x128xf32>
      %cst_26 = arith.constant 1.000000e+00 : f32
      %40 = vector.broadcast %cst_26 : f32 to vector<8x128xf32>
      %41 = arith.addf %40, %39 : vector<8x128xf32>
      %42 = arith.divf %40, %41 : vector<8x128xf32>
      %43 = vector.extract_strided_slice %25 {offsets = [0, 256], sizes = [8, 128], strides = [1, 1]} : vector<8x384xf32> to vector<8x128xf32>
      %44 = vector.extract_strided_slice %26 {offsets = [0, 256], sizes = [8, 128], strides = [1, 1]} : vector<8x384xf32> to vector<8x128xf32>
      %45 = arith.addf %44, %15 : vector<8x128xf32>
      %46 = arith.mulf %34, %45 : vector<8x128xf32>
      %47 = arith.addf %43, %46 : vector<8x128xf32>
      %48 = math.tanh %47 : vector<8x128xf32>
      %49 = arith.subf %arg12, %48 : vector<8x128xf32>
      %50 = arith.mulf %42, %49 : vector<8x128xf32>
      %51 = arith.addf %48, %50 : vector<8x128xf32>
      %52 = arith.index_cast %arg11 : i32 to index
      %c0_27 = arith.constant 0 : index
      %c0_28 = arith.constant 0 : index
      %53 = vector.load %arg7[%52, %c0_27, %c0_28] : memref<8x8x128xf32, #tpu.memory_space<vmem>>, vector<1x8x128xf32>
      %54 = vector.shape_cast %53 : vector<1x8x128xf32> to vector<8x128xf32>
      %55 = vector.shape_cast %51 : vector<8x128xf32> to vector<1x8x128xf32>
      tpu.vector_store %arg7[%52, %c0_27, %c0_28], %55 {strides = array<i32>} : memref<8x8x128xf32, #tpu.memory_space<vmem>>, vector<1x8x128xf32>,
      scf.yield %51 : vector<8x128xf32>
    }
    %c8_i32_17 = arith.constant 8 : i32
    %c0_18 = arith.constant 0 : index
    %c0_19 = arith.constant 0 : index
    %19 = vector.load %arg10[%c0_18, %c0_19] : memref<8x128xf32, #tpu.memory_space<vmem>>, vector<8x128xf32>
    tpu.vector_store %arg10[%c0_18, %c0_19], %18 {strides = array<i32>} : memref<8x128xf32, #tpu.memory_space<vmem>>, vector<8x128xf32>,
    %c0_i32_20 = arith.constant 0 : i32
    %20 = arith.cmpi eq, %arg1, %c0_i32_20 : i32
    %21 = arith.extui %20 : i1 to i32
    %c0_i32_21 = arith.constant 0 : i32
    %22 = arith.cmpi ne, %21, %c0_i32_21 : i32
    scf.if %22 {
      %c0_22 = arith.constant 0 : index
      %c0_23 = arith.constant 0 : index
      %23 = vector.load %arg8[%c0_22, %c0_23] : memref<8x128xf32, #tpu.memory_space<vmem>>, vector<8x128xf32>
      tpu.vector_store %arg8[%c0_22, %c0_23], %18 {strides = array<i32>} : memref<8x128xf32, #tpu.memory_space<vmem>>, vector<8x128xf32>,
    } else {
    }
    return
  }
  func.func @transform_0(%arg0: i32, %arg1: i32) -> (i32, i32, i32) {
    %c0_i32 = arith.constant 0 : i32
    %c0_i32_0 = arith.constant 0 : i32
    return %arg1, %arg0, %c0_i32 : i32, i32, i32
  }
  func.func @transform_1(%arg0: i32, %arg1: i32) -> (i32, i32) {
    %c0_i32 = arith.constant 0 : i32
    %c0_i32_0 = arith.constant 0 : i32
    %c0_i32_1 = arith.constant 0 : i32
    return %c0_i32, %c0_i32_0 : i32, i32
  }
  func.func @transform_2(%arg0: i32, %arg1: i32) -> (i32, i32) {
    %c0_i32 = arith.constant 0 : i32
    %c0_i32_0 = arith.constant 0 : i32
    %c0_i32_1 = arith.constant 0 : i32
    return %c0_i32, %c0_i32_0 : i32, i32
  }
  func.func @transform_3(%arg0: i32, %arg1: i32) -> (i32, i32) {
    %c0_i32 = arith.constant 0 : i32
    %c0_i32_0 = arith.constant 0 : i32
    %c0_i32_1 = arith.constant 0 : i32
    return %c0_i32, %c0_i32_0 : i32, i32
  }
  func.func @transform_4(%arg0: i32, %arg1: i32) -> (i32, i32) {
    %c0_i32 = arith.constant 0 : i32
    %c0_i32_0 = arith.constant 0 : i32
    %c0_i32_1 = arith.constant 0 : i32
    return %c0_i32, %c0_i32_0 : i32, i32
  }
  func.func @transform_5(%arg0: i32, %arg1: i32) -> (i32, i32, i32) {
    %c0_i32 = arith.constant 0 : i32
    %c0_i32_0 = arith.constant 0 : i32
    return %arg1, %arg0, %c0_i32 : i32, i32, i32
  }
  func.func @transform_6(%arg0: i32, %arg1: i32) -> (i32, i32) {
    %c0_i32 = arith.constant 0 : i32
    %c0_i32_0 = arith.constant 0 : i32
    return %arg0, %c0_i32 : i32, i32
  }
}

</mosaic_0001>

<bundles_post_ra>
// kernel: tpu_custom_call.1
= control target key start
LH: loop header
LB: loop body
LE: loop exit
PB: predicated region body
PF: predicated region fallthrough
CT: control target
= control target key end

     0   :  { %12 = vsyncpa [#allocation5], 0  ;;  %s1416_s0 = inlined_call_operand.hbm [shape: f32[8,8,4], index: 0, kind: input, shape index: {}]   ;;  %s1417_s1 = inlined_call_operand.hbm [shape: f32[4,384], index: 1, kind: input, shape index: {}]   ;;  %s1418_s2 = inlined_call_operand.hbm [shape: f32[128,384], index: 2, kind: input, shape index: {}]   ;;  %s1419_s3 = inlined_call_operand.hbm [shape: f32[1,384], index: 3, kind: input, shape index: {}]   ;;  %s1420_s4 = inlined_call_operand.hbm [shape: f32[1,128], index: 4, kind: input, shape index: {}]   ;;  %s1421_s5 = inlined_call_operand.hbm [shape: f32[8,8,128], index: 5, kind: output, shape index: {0}]   ;;  %s1422_s6 = inlined_call_operand.hbm [shape: f32[8,128], index: 6, kind: output, shape index: {1}]  }
   0x1   :  { %13 = vsyncpa [#allocation8], 0 }
   0x2   :  { %14 = vsyncpa [#allocation11], 0 }
   0x3   :  { %15 = vsyncpa [#allocation6], 0 }
   0x4   :  { %16 = vsyncpa [#allocation15], 0  ;;  %s1059_s21 = smov [#allocation7]   ;;  %s1060_s23 = smov [#allocation10]  }
   0x5   :  { %s35_s22 = sshll.u32 %s1059_s21, 4  ;;  %s57_s24 = sshll.u32 %s1060_s23, 4  ;;  %s36_s22 = int_to_ptr.vmem [resolvable:$true] %s35_s22  ;;  %s58_s24 = int_to_ptr.vmem [resolvable:$true] %s57_s24 }
   0x6   :  { %s879_s27 = scalar_lea.hbm %s1417_s1, 192 }
   0x7   :  { %p880_p0 = scmp.ne.s32.totalorder %s1417_s1, %s879_s27  ;;  %p883_p1 = scmp.lt.u32.totalorder %s879_s27, %s1417_s1 }
   0x9   :  { %p885_p2 = pnand %p883_p1, %p880_p0 }
   0xb   :  { %888 = shalt.err (!%p885_p2)
}
   0xc   :  { %s889_s8 = scalar_lea.vmem %s36_s22, 192  ;;  %p894_p4 = scmp.lt.s32.totalorder %s36_s22, %s36_s22 }
   0xd   :  { %p890_p3 = scmp.ne.s32.totalorder %s36_s22, %s889_s8  ;;  %p895_p5 = scmp.lt.s32.totalorder %s889_s8, %s889_s8 }
   0xf   :  { %p896_p6 = por %p895_p5, %p894_p4 }
  0x11   :  { %p897_p7 = pnand %p896_p6, %p890_p3 }
  0x13   :  { %900 = shalt.err (!%p897_p7)
}
  0x14   :  { %38 = dma.hbm_to_vmem [thread:$0]  %s1417_s1, 192, %s36_s22, [#allocation8]  }
  0x15   :  { %s901_s13 = scalar_lea.hbm %s1419_s3, 48 }
  0x16   :  { %p902_p8 = scmp.ne.s32.totalorder %s1419_s3, %s901_s13  ;;  %p905_p9 = scmp.lt.u32.totalorder %s901_s13, %s1419_s3 }
  0x18   :  { %p907_p10 = pnand %p905_p9, %p902_p8 }
  0x1a   :  { %910 = shalt.err (!%p907_p10)
}
  0x1b   :  { %s911_s18 = scalar_lea.vmem %s58_s24, 48  ;;  %s915_s19 = scalar_lea.vmem %s58_s24, 64 }
  0x1c   :  { %p912_p11 = scmp.ne.s32.totalorder %s58_s24, %s911_s18  ;;  %p916_p12 = scmp.lt.s32.totalorder %s58_s24, %s58_s24 }
  0x1d   :  { %p917_p13 = scmp.lt.s32.totalorder %s915_s19, %s911_s18 }
  0x1f   :  { %p918_p0 = por %p917_p13, %p916_p12 }
  0x21   :  { %p919_p1 = pnand %p918_p0, %p912_p11 }
  0x23   :  { %922 = shalt.err (!%p919_p1)
}
  0x24   :  { %60 = dma.hbm_to_vmem [thread:$0]  %s1419_s3, 48, %s58_s24, [#allocation11]  }
  0x25   :  { %s1061_s21 = smov [#allocation4]   ;;  %s923_s26 = scalar_lea.hbm %s1416_s0, 1024 }
  0x26   :  { %s22_s22 = sshll.u32 %s1061_s21, 4  ;;  %p924_p2 = scmp.ne.s32.totalorder %s1416_s0, %s923_s26  ;;  %s23_s22 = int_to_ptr.vmem [resolvable:$true] %s22_s22 }
  0x27   :  { %p927_p3 = scmp.lt.u32.totalorder %s923_s26, %s1416_s0 }
  0x29   :  { %p929_p4 = pnand %p927_p3, %p924_p2 }
  0x2b   :  { %932 = shalt.err (!%p929_p4)
}
  0x2c   :  { %s933_s7 = scalar_lea.vmem %s23_s22, 1024  ;;  %p938_p6 = scmp.lt.s32.totalorder %s23_s22, %s23_s22 }
  0x2d   :  { %p934_p5 = scmp.ne.s32.totalorder %s23_s22, %s933_s7  ;;  %p939_p7 = scmp.lt.s32.totalorder %s933_s7, %s933_s7 }
  0x2f   :  { %p940_p8 = por %p939_p7, %p938_p6 }
  0x31   :  { %p941_p9 = pnand %p940_p8, %p934_p5 }
  0x33   :  { %944 = shalt.err (!%p941_p9)
}
  0x34   :  { %s1062_s3 = smov 128   ;;  %s1063_s24 = smov 8  }
  0x35   :  { %28 = dma.hbm_to_vmem [thread:$0]  %s1416_s0, 1024, %s23_s22, [#allocation5], %s1062_s3, %s1062_s3, %s1063_s24  }
  0x36   :  { %s1064_s10 = smov [#allocation9]   ;;  %s945_s14 = scalar_lea.hbm %s1418_s2, 6144 }
  0x37   :  { %s44_s11 = sshll.u32 %s1064_s10, 4  ;;  %p946_p10 = scmp.ne.s32.totalorder %s1418_s2, %s945_s14  ;;  %s45_s11 = int_to_ptr.vmem [resolvable:$true] %s44_s11 }
  0x38   :  { %p949_p11 = scmp.lt.u32.totalorder %s945_s14, %s1418_s2 }
  0x3a   :  { %p951_p12 = pnand %p949_p11, %p946_p10 }
  0x3c   :  { %954 = shalt.err (!%p951_p12)
}
  0x3d   :  { %s955_s19 = scalar_lea.vmem %s45_s11, 6144  ;;  %p960_p0 = scmp.lt.s32.totalorder %s45_s11, %s45_s11 }
  0x3e   :  { %p956_p13 = scmp.ne.s32.totalorder %s45_s11, %s955_s19  ;;  %p961_p1 = scmp.lt.s32.totalorder %s955_s19, %s955_s19 }
  0x40   :  { %p962_p2 = por %p961_p1, %p960_p0 }
  0x42   :  { %p963_p3 = pnand %p962_p2, %p956_p13 }
  0x44   :  { %966 = shalt.err (!%p963_p3)
}
  0x45   :  { %s1065_s0 = smov 384   ;;  %s1066_s1 = smov 24  }
  0x46   :  { %50 = dma.hbm_to_vmem [thread:$0]  %s1418_s2, 6144, %s45_s11, [#allocation8], %s1065_s0, %s1065_s0, %s1066_s1  }
  0x47   :  { %s1067_s22 = smov [#allocation12]   ;;  %s967_s27 = scalar_lea.hbm %s1420_s4, 16 }
  0x48   :  { %s67_s23 = sshll.u32 %s1067_s22, 4  ;;  %p968_p4 = scmp.ne.s32.totalorder %s1420_s4, %s967_s27  ;;  %s68_s23 = int_to_ptr.vmem [resolvable:$true] %s67_s23 }
  0x49   :  { %p971_p5 = scmp.lt.u32.totalorder %s967_s27, %s1420_s4 }
  0x4b   :  { %p973_p6 = pnand %p971_p5, %p968_p4 }
  0x4d   :  { %976 = shalt.err (!%p973_p6)
}
  0x4e   :  { %s977_s8 = scalar_lea.vmem %s68_s23, 16  ;;  %s981_s2 = scalar_lea.vmem %s68_s23, 32 }
  0x4f   :  { %p978_p7 = scmp.ne.s32.totalorder %s68_s23, %s977_s8  ;;  %p982_p8 = scmp.lt.s32.totalorder %s68_s23, %s68_s23 }
  0x50   :  { %p983_p9 = scmp.lt.s32.totalorder %s981_s2, %s977_s8 }
  0x52   :  { %p984_p10 = por %p983_p9, %p982_p8 }
  0x54   :  { %p985_p11 = pnand %p984_p10, %p978_p7 }
  0x56   :  { %988 = shalt.err (!%p985_p11)
}
  0x57   :  { %70 = dma.hbm_to_vmem [thread:$0]  %s1420_s4, 16, %s68_s23, [#allocation11]  }
  0x58   :  { %1041 = dma.done.wait [#allocation5], 1024  }
  0x59   :  { %1042 = vsyncadd [#allocation5], 4294966272 }
  0x5a   :  { %1043 = dma.done.wait [#allocation8], 6336  }
  0x5b   :  { %1044 = vsyncadd [#allocation8], 4294960960 }
  0x5c   :  { %1045 = dma.done.wait [#allocation11], 64  }
  0x5d   :  { %1046 = vsyncadd [#allocation11], 4294967232  ;;  %v1068_v0 = vmov 0.0   ;;  %v1174_v1 = vld [vmem:[#allocation9] sm:$0xff]  ;;  %v1176_v2 = vld [vmem:[#allocation9 + $0x8] sm:$0xff]  ;;  %vm146_vm0 = vcmask 1043456   ;;  %v103_v61 = vlaneseq }
  0x5e   :  { %217 = vmatprep.mubr.f32.mxu0 %v1068_v0  ;;  %253 = vmatprep.mubr.f32.mxu1 %v1068_v0  ;;  %v1178_v3 = vld [vmem:[#allocation9 + $0x10] sm:$0xff]  ;;  %v1180_v4 = vld [vmem:[#allocation9 + $0x18] sm:$0xff]  ;;  %v1182_v5 = vld [vmem:[#allocation9 + $0x20] sm:$0xff]  ;;  %vm121_vm1 = vcmask 31744   ;;  %s1322_s4 = smov 0  }
  0x5f   :  { %v1184_v6 = vld [vmem:[#allocation9 + $0x28] sm:$0xff]  ;;  %v1186_v7 = vld [vmem:[#allocation9 + $0x30] sm:$0xff]  ;;  %v1188_v8 = vld [vmem:[#allocation9 + $0x38] sm:$0xff]  ;;  %v104_v62 = vshrl.u32 %v103_v61, 7 }
  0x60   :  { %v1190_v9 = vld [vmem:[#allocation9 + $0x40] sm:$0xff]  ;;  %v1192_v10 = vld [vmem:[#allocation9 + $0x48] sm:$0xff]  ;;  %v1194_v11 = vld [vmem:[#allocation9 + $0x50] sm:$0xff] }
  0x61   :  { %v1196_v12 = vld [vmem:[#allocation9 + $0x58] sm:$0xff]  ;;  %v1198_v13 = vld [vmem:[#allocation9 + $0x60] sm:$0xff]  ;;  %v1200_v14 = vld [vmem:[#allocation9 + $0x68] sm:$0xff]  ;;  %v105_v63 = vsub.s32 0, %v104_v62 }
  0x62   :  { %v1202_v15 = vld [vmem:[#allocation9 + $0x70] sm:$0xff]  ;;  %v1204_v16 = vld [vmem:[#allocation9 + $0x78] sm:$0xff]  ;;  %v1206_v17 = vld [vmem:[#allocation9 + $0x80] sm:$0xff] }
  0x63   :  { %v1208_v18 = vld [vmem:[#allocation9 + $0x88] sm:$0xff]  ;;  %v1210_v19 = vld [vmem:[#allocation9 + $0x90] sm:$0xff]  ;;  %v1212_v20 = vld [vmem:[#allocation9 + $0x98] sm:$0xff] }
  0x64   :  { %v1214_v21 = vld [vmem:[#allocation9 + $0xa0] sm:$0xff]  ;;  %v1216_v22 = vld [vmem:[#allocation9 + $0xa8] sm:$0xff]  ;;  %v1218_v23 = vld [vmem:[#allocation9 + $0xb0] sm:$0xff] }
  0x65   :  { %v1220_v24 = vld [vmem:[#allocation9 + $0xb8] sm:$0xff]  ;;  %v1222_v25 = vld [vmem:[#allocation9 + $0xc0] sm:$0xff]  ;;  %v1224_v26 = vld [vmem:[#allocation9 + $0xc8] sm:$0xff] }
  0x66   :  { %v1226_v27 = vld [vmem:[#allocation9 + $0xd0] sm:$0xff]  ;;  %v1228_v28 = vld [vmem:[#allocation9 + $0xd8] sm:$0xff]  ;;  %v1230_v29 = vld [vmem:[#allocation9 + $0xe0] sm:$0xff] }
  0x67   :  { %v1232_v30 = vld [vmem:[#allocation9 + $0xe8] sm:$0xff]  ;;  %v1234_v31 = vld [vmem:[#allocation9 + $0xf0] sm:$0xff]  ;;  %v1236_v32 = vld [vmem:[#allocation9 + $0xf8] sm:$0xff] }
  0x68   :  { %v1238_v33 = vld [vmem:[#allocation9 + $0x100] sm:$0xff]  ;;  %v1240_v34 = vld [vmem:[#allocation9 + $0x108] sm:$0xff]  ;;  %v1242_v35 = vld [vmem:[#allocation9 + $0x110] sm:$0xff] }
  0x69   :  { %v1244_v36 = vld [vmem:[#allocation9 + $0x118] sm:$0xff]  ;;  %v1246_v37 = vld [vmem:[#allocation9 + $0x120] sm:$0xff]  ;;  %v1248_v38 = vld [vmem:[#allocation9 + $0x128] sm:$0xff] }
  0x6a   :  { %v1250_v39 = vld [vmem:[#allocation9 + $0x130] sm:$0xff]  ;;  %v1252_v40 = vld [vmem:[#allocation9 + $0x138] sm:$0xff]  ;;  %v1254_v41 = vld [vmem:[#allocation9 + $0x140] sm:$0xff] }
  0x6b   :  { %v1256_v42 = vld [vmem:[#allocation9 + $0x148] sm:$0xff]  ;;  %v1258_v43 = vld [vmem:[#allocation9 + $0x150] sm:$0xff]  ;;  %v1260_v44 = vld [vmem:[#allocation9 + $0x158] sm:$0xff] }
  0x6c   :  { %v1262_v45 = vld [vmem:[#allocation9 + $0x160] sm:$0xff]  ;;  %v1264_v46 = vld [vmem:[#allocation9 + $0x168] sm:$0xff]  ;;  %v1266_v47 = vld [vmem:[#allocation9 + $0x170] sm:$0xff] }
  0x6d   :  { %1423 = vst [vmem:[#allocation21_spill] sm:$0xff] %v1262_v45  ;;  %1424 = vst [vmem:[#allocation22_spill] sm:$0xff] %v1264_v46  ;;  %v1268_v48 = vld [vmem:[#allocation9 + $0x178] sm:$0xff]  ;;  %v1270_v49 = vld [vmem:[#allocation12] ss:$0 sm:$0xff] }
  0x6e   :  { %1425 = vst [vmem:[#allocation23_spill] sm:$0xff] %v1268_v48  ;;  %1426 = vst [vmem:[#allocation24_spill] sm:$0xff] %v1270_v49  ;;  %v99_v50 = vld [vmem:[#allocation7] sm:$0xff]  ;;  %v97_v53 = vld [vmem:[#allocation4 + $0x30] sm:$0xff] }
  0x6f   :  { %v120_v51 = vcombine.high %v99_v50, %v99_v50  ;;  %v91_v52 = vld [vmem:[#allocation4] sm:$0xff]  ;;  %v100_v54 = vld [vmem:[#allocation7 + $0x8] sm:$0xf]  ;;  %v98_v56 = vld [vmem:[#allocation4 + $0x38] sm:$0xff] }
  0x70   :  { %v92_v55 = vld [vmem:[#allocation4 + $0x8] sm:$0xff]  ;;  %v93_v57 = vld [vmem:[#allocation4 + $0x10] sm:$0xff]  ;;  %v94_v58 = vld [vmem:[#allocation4 + $0x18] sm:$0xff] }
  0x71   :  { %679 = vmatprep.subr.msk.mxu0 %vm146_vm0, %v120_v51  ;;  %835 = vmatprep.subr.msk.mxu1 %vm146_vm0, %v120_v51  ;;  %v95_v59 = vld [vmem:[#allocation4 + $0x20] sm:$0xff]  ;;  %v96_v60 = vld [vmem:[#allocation4 + $0x28] sm:$0xff]  ;;  %v109_v51 = vsub.s32 1, %v104_v62 }
  0x72   :  { %680 = vmatpush1.msk.msra.mxu0 %vm146_vm0, %v99_v50  ;;  %836 = vmatpush1.msk.msra.mxu1 %vm146_vm0, %v99_v50  ;;  %v101_v50 = vld [vmem:[#allocation10] sm:$0x7] }
  0x73   :  { %681 = vmatmul.mubr.msk.f32.vlgmr.msra.gmra.mrb[0].mxu0 %vm121_vm1, %v91_v52  ;;  %687 = vmatmul.mubr.msk.f32.vlgmr.msra.gmra.mrb[0].mxu1 %vm121_vm1, %v97_v53 }
  0x74   :  { %730 = vmatprep.subr.msk.mxu1 %vm146_vm0, %v100_v54  ;;  %223 = vmatprep.mubr.f32.mxu0 %v1068_v0 }
  0x75   :  { %731 = vmatpush3.msk.msra.mxu1 %vm146_vm0, %v100_v54  ;;  %259 = vmatprep.mubr.f32.mxu1 %v1068_v0  ;;  %v1302_v54 = vrot.slane %v101_v50, %v109_v51 }
  0x77   :  { %682 = vmatmul.mubr.msk.f32.gmra.mrb[2].mxu0 %vm121_vm1, %v92_v55  ;;  %688 = vmatmul.mubr.msk.f32.gmra.mrb[2].mxu1 %vm121_vm1, %v98_v56 }
  0x78   :  { %229 = vmatprep.mubr.f32.mxu0 %v1068_v0  ;;  %732 = vmatprep.mubr.msk.f32.mxu1 %vm121_vm1, %v91_v52  ;;  %v1300_v52 = vrot.slane %v101_v50, %v105_v63 }
  0x7b   :  { %683 = vmatmul.mubr.msk.f32.gmra.mrb[4].mxu0 %vm121_vm1, %v93_v57  ;;  %733 = vmatmul.mubr.msk.f32.vlgmr.msra.gmra.mrb[4].mxu1 %vm121_vm1, %v92_v55 }
  0x7c   :  { %235 = vmatprep.mubr.f32.mxu0 %v1068_v0  ;;  %735 = vmatprep.mubr.msk.f32.mxu1 %vm121_vm1, %v93_v57 }
  0x7f   :  { %684 = vmatmul.mubr.msk.f32.gmra.mrb[6].mxu0 %vm121_vm1, %v94_v58  ;;  %736 = vmatmul.mubr.msk.f32.gmra.mrb[6].mxu1 %vm121_vm1, %v94_v58 }
  0x80   :  { %241 = vmatprep.mubr.f32.mxu0 %v1068_v0  ;;  %738 = vmatprep.mubr.msk.f32.mxu1 %vm121_vm1, %v95_v59 }
  0x83   :  { %685 = vmatmul.mubr.msk.f32.gmra.mrb[8].mxu0 %vm121_vm1, %v95_v59  ;;  %739 = vmatmul.mubr.msk.f32.gmra.mrb[8].mxu1 %vm121_vm1, %v96_v60 }
  0x84   :  { %247 = vmatprep.mubr.f32.mxu0 %v1068_v0  ;;  %741 = vmatprep.mubr.msk.f32.mxu1 %vm121_vm1, %v97_v53 }
  0x87   :  { %686 = vmatmul.mubr.msk.f32.gmra.mrb[10].mxu0 %vm121_vm1, %v96_v60  ;;  %742 = vmatmul.mubr.msk.f32.gmra.mrb[10].mxu1 %vm121_vm1, %v98_v56  ;;  %v113_v60 = vsub.s32 2, %v104_v62 }
 0x146   :  { %v219_v55 = vpop.f32.mrb[0].mxu0  ;;  %v255_v57 = vpop.f32.mrb[0].mxu1 }
 0x147   :  { %v220_v58 = vadd.f32 %v219_v55, %v1300_v52  ;;  %v256_v0 = vadd.f32 %v255_v57, %v1300_v52  ;;  %v221_v53 = vpop.f32.mrb[1].mxu0  ;;  %v257_v59 = vpop.f32.mrb[1].mxu1  ;;  %v114_v57 = vrot.slane %v101_v50, %v113_v60 }
 0x148   :  { %v222_v56 = vadd.f32 %v221_v53, %v1302_v54  ;;  %v258_v61 = vadd.f32 %v257_v59, %v1302_v54 }
 0x149   :  { %371 = vst [vmem:[#allocation2] sm:$0xff] %v220_v58  ;;  %389 = vst [vmem:[#allocation2 + $0x90] sm:$0xff] %v256_v0 }
 0x14a   :  { %372 = vst [vmem:[#allocation2 + $0x8] sm:$0xff] %v222_v56  ;;  %390 = vst [vmem:[#allocation2 + $0x98] sm:$0xff] %v258_v61  ;;  %v225_v63 = vpop.f32.mrb[2].mxu0  ;;  %v261_v51 = vpop.f32.mrb[2].mxu1 }
 0x14b   :  { %v226_v49 = vadd.f32 %v225_v63, %v1300_v52  ;;  %v262_v48 = vadd.f32 %v261_v51, %v1300_v52  ;;  %v227_v55 = vpop.f32.mrb[3].mxu0  ;;  %v263_v45 = vpop.f32.mrb[3].mxu1 }
 0x14c   :  { %v228_v46 = vadd.f32 %v227_v55, %v1302_v54  ;;  %v264_v62 = vadd.f32 %v263_v45, %v1302_v54 }
 0x14d   :  { %374 = vst [vmem:[#allocation2 + $0x18] sm:$0xff] %v226_v49  ;;  %392 = vst [vmem:[#allocation2 + $0xa8] sm:$0xff] %v262_v48 }
 0x14e   :  { %375 = vst [vmem:[#allocation2 + $0x20] sm:$0xff] %v228_v46  ;;  %393 = vst [vmem:[#allocation2 + $0xb0] sm:$0xff] %v264_v62  ;;  %v231_v58 = vpop.f32.mrb[4].mxu0  ;;  %v734_v0 = vpop.f32.mrb[4].mxu1 }
 0x14f   :  { %v232_v53 = vadd.f32 %v231_v58, %v1300_v52  ;;  %v338_v59 = vadd.f32 %v734_v0, %v114_v57  ;;  %v233_v56 = vpop.f32.mrb[5].mxu0  ;;  %v332_v61 = vpop.f32.mrb[5].mxu1 }
 0x150   :  { %v234_v63 = vadd.f32 %v233_v56, %v1302_v54  ;;  %v333_v51 = vadd.f32 %v332_v61, %v114_v57 }
 0x151   :  { %377 = vst [vmem:[#allocation2 + $0x30] sm:$0xff] %v232_v53  ;;  %376 = vst [vmem:[#allocation2 + $0x28] sm:$0xff] %v338_v59 }
 0x152   :  { %378 = vst [vmem:[#allocation2 + $0x38] sm:$0xff] %v234_v63  ;;  %373 = vst [vmem:[#allocation2 + $0x10] sm:$0xff] %v333_v51  ;;  %v237_v50 = vpop.f32.mrb[6].mxu0  ;;  %v737_v45 = vpop.f32.mrb[6].mxu1 }
 0x153   :  { %v238_v48 = vadd.f32 %v237_v50, %v1300_v52  ;;  %v348_v46 = vadd.f32 %v737_v45, %v114_v57  ;;  %v239_v49 = vpop.f32.mrb[7].mxu0  ;;  %v342_v60 = vpop.f32.mrb[7].mxu1 }
 0x154   :  { %v240_v55 = vadd.f32 %v239_v49, %v1302_v54  ;;  %v343_v62 = vadd.f32 %v342_v60, %v114_v57 }
 0x155   :  { %380 = vst [vmem:[#allocation2 + $0x48] sm:$0xff] %v238_v48  ;;  %382 = vst [vmem:[#allocation2 + $0x58] sm:$0xff] %v348_v46 }
 0x156   :  { %381 = vst [vmem:[#allocation2 + $0x50] sm:$0xff] %v240_v55  ;;  %379 = vst [vmem:[#allocation2 + $0x40] sm:$0xff] %v343_v62  ;;  %v243_v58 = vpop.f32.mrb[8].mxu0  ;;  %v740_v0 = vpop.f32.mrb[8].mxu1 }
 0x157   :  { %v244_v53 = vadd.f32 %v243_v58, %v1300_v52  ;;  %v358_v59 = vadd.f32 %v740_v0, %v114_v57  ;;  %v245_v56 = vpop.f32.mrb[9].mxu0  ;;  %v352_v61 = vpop.f32.mrb[9].mxu1  ;;  %v1320_v58 = vmov 0.0  }
 0x158   :  { %v246_v63 = vadd.f32 %v245_v56, %v1302_v54  ;;  %v353_v51 = vadd.f32 %v352_v61, %v114_v57 }
 0x159   :  { %383 = vst [vmem:[#allocation2 + $0x60] sm:$0xff] %v244_v53  ;;  %388 = vst [vmem:[#allocation2 + $0x88] sm:$0xff] %v358_v59 }
 0x15a   :  { %384 = vst [vmem:[#allocation2 + $0x68] sm:$0xff] %v246_v63  ;;  %385 = vst [vmem:[#allocation2 + $0x70] sm:$0xff] %v353_v51  ;;  %v249_v50 = vpop.f32.mrb[10].mxu0  ;;  %v743_v45 = vpop.f32.mrb[10].mxu1 }
 0x15b   :  { %v250_v48 = vadd.f32 %v249_v50, %v1300_v52  ;;  %v368_v46 = vadd.f32 %v743_v45, %v114_v57  ;;  %v251_v49 = vpop.f32.mrb[11].mxu0  ;;  %v362_v60 = vpop.f32.mrb[11].mxu1 }
 0x15c   :  { %v252_v55 = vadd.f32 %v251_v49, %v1302_v54  ;;  %v363_v62 = vadd.f32 %v362_v60, %v114_v57 }
 0x15d   :  { %386 = vst [vmem:[#allocation2 + $0x78] sm:$0xff] %v250_v48  ;;  %394 = vst [vmem:[#allocation2 + $0xb8] sm:$0xff] %v368_v46 }
 0x15e   :  { %387 = vst [vmem:[#allocation2 + $0x80] sm:$0xff] %v252_v55  ;;  %391 = vst [vmem:[#allocation2 + $0xa0] sm:$0xff] %v363_v62 }
 0x15f LB: > { %v779_v52 = vpack.c.bf16 %v1182_v5, %v1176_v2  ;;  %v781_v54 = vpack.c.bf16 %v1180_v4, %v1174_v1  ;;  %v783_v57 = vpack.c.bf16 %v1194_v11, %v1188_v8  ;;  %v785_v0 = vpack.c.bf16 %v1192_v10, %v1186_v7  ;;  %s703_s11 = smul.u32 24, %s1057_s4  ;;  %s702_s13 = sshll.u32 %s1057_s4, 3  ;;  %s1057_s4 = sphi %s1322_s4, %s456_s4   ;;  %v1053_v58 = vphi %v1320_v58, %v1431_v58  }
 0x160   : > { %v812_v53 = vpack.c.bf16 %v1184_v6, %v1178_v3  ;;  %v787_v59 = vpack.c.bf16 %v1206_v17, %v1200_v14  ;;  %v1069_v56 = vmov 0.0|0.0   ;;  %v815_v61 = vpack.c.bf16 %v1196_v12, %v1190_v9  ;;  %s627_s14 = scalar_lea.vmem [#allocation13], %s702_s13  ;;  %s456_s4 = sadd.s32 1, %s1057_s4  }
 0x161   : > { %780 = vmatprep.subr.bf16.mxu0 %v779_v52  ;;  %811 = vmatprep.subr.bf16.mxu1 %v1069_v56  ;;  %v1070_v63 = vmov 0.0   ;;  %v789_v51 = vpack.c.bf16 %v1204_v16, %v1198_v13  ;;  %v791_v50 = vpack.c.bf16 %v1218_v23, %v1212_v20  ;;  %vm1071_vm2 = vmmov 0   ;;  %s460_s12 = scalar_lea.vmem [#allocation2], %s703_s11  ;;  %p453_p12 = scmp.ge.s32.totalorder %s456_s4, 8  }
 0x162   : > { %782 = vmatpush1.bf16.msra.mxu0 %v781_v54  ;;  %813 = vmatpush3.bf16.msra.mxu1 %v812_v53  ;;  %v818_v45 = vpack.c.bf16 %v1208_v18, %v1202_v15  ;;  %v793_v48 = vpack.c.bf16 %v1216_v22, %v1210_v19  ;;  %v795_v46 = vpack.c.bf16 %v1230_v29, %v1224_v26  ;;  %s1072_s15 = smov (%p453_p12), [#allocation13]   ;;  %s1073_s17 = smov (%p453_p12), [#allocation14]  }
 0x163   : > { %784 = vmatprep.subr.bf16.mxu0 %v783_v57  ;;  %528 = vmatprep.mubr.f32.mxu0 %v1070_v63  ;;  %v821_v49 = vpack.c.bf16 %v1220_v24, %v1214_v21  ;;  %v797_v60 = vpack.c.bf16 %v1228_v28, %v1222_v25  ;;  %v799_v55 = vpack.c.bf16 %v1242_v35, %v1236_v32  ;;  %s639_s16 = sshll.u32 (%p453_p12), %s1072_s15, 4  ;;  %s652_s18 = sshll.u32 (%p453_p12), %s1073_s17, 4  ;;  %s640_s16 = int_to_ptr.vmem [resolvable:$true] %s639_s16  ;;  %s653_s18 = int_to_ptr.vmem [resolvable:$true] %s652_s18 }
 0x164   : > { %814 = vmatprep.subr.bf16.mxu1 %v1069_v56  ;;  %776 = vmatprep.mubr.msk.f32.mxu1 %vm1071_vm2, %v1070_v63  ;;  %v824_v62 = vpack.c.bf16 %v1232_v30, %v1226_v27  ;;  %v801_v52 = vpack.c.bf16 %v1240_v34, %v1234_v31  ;;  %v803_v54 = vpack.c.bf16 %v1254_v41, %v1248_v38  ;;  %s989_s19 = scalar_lea.vmem (%p453_p12), %s640_s16, 1024  ;;  %p994_p0 = scmp.lt.s32.totalorder (%p453_p12), %s640_s16, %s640_s16 }
 0x165   : > { %v827_v57 = vpack.c.bf16 %v1244_v36, %v1238_v33  ;;  %v807_v53 = vpack.c.bf16 %v1266_v47, %v1260_v44  ;;  %p990_p13 = scmp.ne.s32.totalorder (%p453_p12), %s640_s16, %s989_s19  ;;  %p995_p1 = scmp.lt.s32.totalorder (%p453_p12), %s989_s19, %s989_s19 }
 0x166   : > { %786 = vmatpush1.bf16.msra.mxu0 %v785_v0  ;;  %816 = vmatpush3.bf16.msra.mxu1 %v815_v61  ;;  %v805_v0 = vpack.c.bf16 %v1252_v40, %v1246_v37  ;;  %v1427_v61 = vld [vmem:[#allocation22_spill] sm:$0xff] }
 0x167   : > { %788 = vmatprep.subr.bf16.mxu0 %v787_v59  ;;  %817 = vmatprep.subr.bf16.mxu1 %v1069_v56  ;;  %v830_v59 = vpack.c.bf16 %v1256_v42, %v1250_v39  ;;  %v809_v63 = vpack.c.bf16 %v1427_v61, %v1258_v43  ;;  %p996_p2 = por (%p453_p12), %p995_p1, %p994_p0 }
 0x169   :  { %p997_p3 = pnand (%p453_p12), %p996_p2, %p990_p13 }
 0x16a   : > { %790 = vmatpush1.bf16.msra.mxu0 %v789_v51  ;;  %819 = vmatpush3.bf16.msra.mxu1 %v818_v45  ;;  %v1428_v51 = vld [vmem:[#allocation21_spill] sm:$0xff] }
 0x16b   : > { %792 = vmatprep.subr.bf16.mxu0 %v791_v50  ;;  %820 = vmatprep.subr.bf16.mxu1 %v1069_v56  ;;  %v1429_v50 = vld [vmem:[#allocation23_spill] sm:$0xff] }
 0x16c   : > { %v833_v45 = vpack.c.bf16 %v1429_v50, %v1428_v51  ;;  %v463_v50 = vld [vmem:[%s460_s12 + $0x10] sm:$0xff] }
 0x16e   : > { %794 = vmatpush1.bf16.msra.mxu0 %v793_v48  ;;  %822 = vmatpush3.bf16.msra.mxu1 %v821_v49  ;;  %v461_v48 = vld [vmem:[%s460_s12] sm:$0xff] }
 0x16f   : > { %796 = vmatprep.subr.bf16.mxu0 %v795_v46  ;;  %823 = vmatprep.subr.bf16.mxu1 %v1069_v56 }
 0x172   : > { %798 = vmatpush1.bf16.msra.mxu0 %v797_v60  ;;  %825 = vmatpush3.bf16.msra.mxu1 %v824_v62 }
 0x173   : > { %800 = vmatprep.subr.bf16.mxu0 %v799_v55  ;;  %826 = vmatprep.subr.bf16.mxu1 %v1069_v56 }
 0x176   : > { %802 = vmatpush1.bf16.msra.mxu0 %v801_v52  ;;  %828 = vmatpush3.bf16.msra.mxu1 %v827_v57 }
 0x177   : > { %804 = vmatprep.subr.bf16.mxu0 %v803_v54  ;;  %829 = vmatprep.subr.bf16.mxu1 %v1069_v56  ;;  %v462_v54 = vld [vmem:[%s460_s12 + $0x8] sm:$0xff] }
 0x17a   : > { %806 = vmatpush1.bf16.msra.mxu0 %v805_v0  ;;  %831 = vmatpush3.bf16.msra.mxu1 %v830_v59  ;;  %v1430_v59 = vld [vmem:[#allocation24_spill] sm:$0xff] }
 0x17b   : > { %808 = vmatprep.subr.bf16.mxu0 %v807_v53  ;;  %832 = vmatprep.subr.bf16.mxu1 %v1069_v56 }
 0x17e   : > { %810 = vmatpush1.bf16.msra.mxu0 %v809_v63  ;;  %834 = vmatpush3.bf16.msra.mxu1 %v833_v45 }
 0x181   : > { %529 = vmatmul.mubr.f32.vlgmr.msra.gmra.mrb[0].mxu0 %v1053_v58  ;;  %777 = vmatmul.mubr.f32.vlgmr.msra.gmra.mrb[0].mxu1 %v1053_v58 }
 0x254   : > { %v530_v46 = vpop.f32.mrb[0].mxu0  ;;  %v601_v55 = vpop.f32.mrb[0].mxu1 }
 0x255   : > { %v605_v49 = vadd.f32 %v530_v46, %v461_v48  ;;  %v532_v60 = vpop.f32.mrb[1].mxu0  ;;  %v778_v52 = vpop.f32.mrb[1].mxu1  ;;  %v619_v61 = vadd.f32 %v1430_v59, %v601_v55 }
 0x256   : > { %v612_v57 = vadd.f32 %v532_v60, %v462_v54 }
 0x257   : > { %v700_v62 = vmul.f32 -1.442695, %v605_v49 }
 0x258   : > { %v701_v56 = vmul.f32 -1.442695, %v612_v57 }
 0x259   : > { %869 = vpow2.f32 %v700_v62 }
 0x25a   : > { %871 = vpow2.f32 %v701_v56 }
 0x263   : > { %v870_v0 = vpop.eup %869 }
 0x264   : > { %v609_v53 = vadd.f32 1.0, %v870_v0  ;;  %v872_v63 = vpop.eup %871 }
 0x265   : > { %v616_v48 = vadd.f32 1.0, %v872_v63 }
 0x266   : > { %873 = vrcp.f32 %v609_v53 }
 0x270   : > { %v874_v51 = vpop.eup %873 }
 0x271   : > { %v620_v45 = vmul.f32 %v874_v51, %v619_v61 }
 0x273   : > { %v621_v46 = vadd.f32 %v620_v45, %v463_v50 }
 0x275   : > { %875 = vtanh.f32 %v621_v46 }
 0x276   : > { %877 = vrcp.f32 %v616_v48 }
 0x27f   : > { %v876_v49 = vpop.eup %875 }
 0x280   : > { %v623_v60 = vsub.f32 %v1053_v58, %v876_v49  ;;  %v878_v62 = vpop.eup %877  ;;  %455 = sbr.rel (!%p453_p12) target bundleno = 351 (0x15f), region = 85 }
 0x282   : > { %v624_v52 = vmul.f32 %v878_v62, %v623_v60 }
 0x284   : > { %v625_v54 = vadd.f32 %v876_v49, %v624_v52  }
 0x286   : > { %628 = vst [vmem:[%s627_s14] sm:$0xff] %v625_v54  ;;  %v1431_v58 = vmov %v625_v54  ;;  %633 = vst [vmem:[#allocation14] sm:$0xff] (%p453_p12), %v625_v54 }
 0x287   :  { %1000 = shalt.err (!%p997_p3)
}
 0x288   :  { %s1001_s20 = scalar_lea.hbm %s1421_s5, 1024 }
 0x289   :  { %p1002_p4 = scmp.ne.s32.totalorder %s1421_s5, %s1001_s20  ;;  %p1005_p5 = scmp.lt.u32.totalorder %s1001_s20, %s1421_s5 }
 0x28b   :  { %p1007_p6 = pnand %p1005_p5, %p1002_p4 }
 0x28d   :  { %1010 = shalt.err (!%p1007_p6)
}
 0x28e   :  { %645 = dma.vmem_to_hbm [thread:$0]  %s640_s16, 1024, %s1421_s5, [#allocation6], %s1062_s3, %s1062_s3, %s1063_s24  }
 0x28f   :  { %s1011_s28 = scalar_lea.vmem %s653_s18, 128  ;;  %p1016_p8 = scmp.lt.s32.totalorder %s653_s18, %s653_s18 }
 0x290   :  { %p1012_p7 = scmp.ne.s32.totalorder %s653_s18, %s1011_s28  ;;  %p1017_p9 = scmp.lt.s32.totalorder %s1011_s28, %s1011_s28 }
 0x292   :  { %p1018_p10 = por %p1017_p9, %p1016_p8 }
 0x294   :  { %p1019_p11 = pnand %p1018_p10, %p1012_p7 }
 0x296   :  { %1022 = shalt.err (!%p1019_p11)
}
 0x297   :  { %s1023_s7 = scalar_lea.hbm %s1422_s6, 128 }
 0x298   :  { %p1024_p12 = scmp.ne.s32.totalorder %s1422_s6, %s1023_s7  ;;  %p1027_p13 = scmp.lt.u32.totalorder %s1023_s7, %s1422_s6 }
 0x29a   :  { %p1029_p0 = pnand %p1027_p13, %p1024_p12 }
 0x29c   :  { %1032 = shalt.err (!%p1029_p0)
}
 0x29d   :  { %655 = dma.vmem_to_hbm [thread:$0]  %s653_s18, 128, %s1422_s6, [#allocation15]  }
 0x29e   :  { %1047 = dma.done.wait [#allocation6], 1024  }
 0x29f   :  { %1048 = vsyncadd [#allocation6], 4294966272 }
 0x2a0   :  { %1049 = dma.done.wait [#allocation15], 128  }
 0x2a1   :  { %1050 = vsyncadd [#allocation15], 4294967168 }
 0x2a2   :  { %662 = vsyncpa [#allocation5], 1 }
 0x2a3   :  { %663 = vsyncpa [#allocation8], 1 }
 0x2a4   :  { %664 = vsyncpa [#allocation11], 1 }
 0x2a5   :  { %665 = vsyncpa [#allocation6], 1 }
 0x2a6   :  { %666 = vsyncpa [#allocation15], 1 }

</bundles_post_ra>
